<compile_context>
chip_gen: v7x
topology: tpu7x:2x2x1
jax: 0.10.0
libtpu: 0.0.40
codegen_flags: <defaults>
</compile_context>

<pallas_src>
import functools

import jax
import jax.numpy as jnp
from jax.experimental import pallas as pl
from jax.experimental.pallas import tpu as pltpu

SEG = 128  # lane-aligned segment width used for all weight/bias packing


def _round_up(x, m):
    return (x + m - 1) // m * m


def _choose_tb(batch, block_rows):
    """Batch tile size: multiple of 16, and >=2 grid steps when B > 16."""
    if batch <= 8:
        return 8
    tb = min(block_rows, _round_up(batch, 16))
    if batch > 16 and pl.cdiv(batch, tb) < 2:
        tb = max(16, _round_up((batch + 1) // 2, 16))
    return tb


def box_decoder_kernel(pc_ref, box_ref, feat_ref,
                       w1_ref, wb_ref, wf_ref, w2_ref, w3_ref, b_ref,
                       out_ref):
    f32 = jnp.float32
    cdt = w2_ref.dtype  # bf16 compute/storage dtype for MXU operands

    # Biases live in one (1, 5*SEG) f32 buffer at 128-aligned lane offsets;
    # padded lanes are zero so they never perturb the padded activation lanes.
    b1 = b_ref[:, 0:SEG]
    bb = b_ref[:, SEG:2 * SEG]
    bf = b_ref[:, 2 * SEG:3 * SEG]
    b2 = b_ref[:, 3 * SEG:4 * SEG]
    b3 = b_ref[:, 4 * SEG:5 * SEG]

    pc = pc_ref[...].astype(cdt)        # (TB, PC)
    box = box_ref[...].astype(cdt)      # (TB, 3)
    feat = feat_ref[...].astype(cdt)    # (TB, F)

    # Stage 1: three independent branches, each producing a lane-dense
    # (TB, 128) tanh activation (padded lanes are exactly 0: zero weight
    # columns + zero bias lanes, tanh(0) = 0).  Cast to bf16 once, at the tanh.
    h1 = jnp.tanh(jnp.dot(pc, w1_ref[...],
                          preferred_element_type=f32) + b1).astype(cdt)
    hb = jnp.tanh(jnp.dot(box, wb_ref[...],
                          preferred_element_type=f32) + bb).astype(cdt)
    hf = jnp.tanh(jnp.dot(feat, wf_ref[...],
                          preferred_element_type=f32) + bf).astype(cdt)

    # Stage 2: output = tanh(mlp2(tanh(mlp1(pc)))).
    h2 = jnp.tanh(jnp.dot(h1, w2_ref[...],
                          preferred_element_type=f32) + b2).astype(cdt)

    # Stage 3: mlp3(cat([output, output_box, output_feature])) as three dots
    # against 128-aligned sublane segments of the packed, lane-dense w3.
    reg = (jnp.dot(h2, w3_ref[0:SEG, :], preferred_element_type=f32)
           + jnp.dot(hb, w3_ref[SEG:2 * SEG, :], preferred_element_type=f32)
           + jnp.dot(hf, w3_ref[2 * SEG:3 * SEG, :], preferred_element_type=f32)
           + b3)

    out_ref[...] = reg.astype(out_ref.dtype)  # (TB, 128), lanes 0:3 meaningful


def box_decoder(pc_feature, input_box, feature, packed, *, block_rows=512):
    """BoxDecoder forward in one pallas_call with a batch grid."""
    B, PC = pc_feature.shape
    F = feature.shape[1]

    TB = _choose_tb(B, block_rows)
    grid = (pl.cdiv(B, TB),)

    pinned = lambda i: (0, 0)  # weights/biases resident across grid steps

    flops = 2 * B * (PC * F + 3 * 100 + F * F + F * F + (2 * F + 100) * 3)
    transcendentals = B * (3 * F + 100)
    bytes_accessed = (B * (PC + 3 + F) * 4          # f32 activations in
                      + B * SEG * 4                 # lane-dense f32 out
                      + ((PC + 3 + F) * SEG + SEG * SEG + 3 * SEG * SEG) * 2
                      + 5 * SEG * 4)                # biases

    out = pl.pallas_call(
        box_decoder_kernel,
        out_shape=jax.ShapeDtypeStruct((B, SEG), jnp.float32),
        grid=grid,
        in_specs=[
            pl.BlockSpec((TB, PC), lambda i: (i, 0)),     # pc_feature stream
            pl.BlockSpec((TB, 3), lambda i: (i, 0)),      # input_box stream
            pl.BlockSpec((TB, F), lambda i: (i, 0)),      # feature stream
            pl.BlockSpec((PC, SEG), pinned),              # mlp1 (lane-padded)
            pl.BlockSpec((3, SEG), pinned),               # mlp_box (lane-padded)
            pl.BlockSpec((F, SEG), pinned),               # mlp_feature (padded)
            pl.BlockSpec((SEG, SEG), pinned),             # mlp2 (padded)
            pl.BlockSpec((3 * SEG, SEG), pinned),         # mlp3 (packed, padded)
            pl.BlockSpec((1, 5 * SEG), pinned),           # all biases
        ],
        out_specs=pl.BlockSpec((TB, SEG), lambda i: (i, 0)),
        compiler_params=pltpu.CompilerParams(
            dimension_semantics=("parallel",)),
        cost_estimate=pl.CostEstimate(
            flops=flops, transcendentals=transcendentals,
            bytes_accessed=bytes_accessed),
    )(pc_feature, input_box, feature,
      packed["w1"], packed["w_box"], packed["w_feat"],
      packed["w2"], packed["w3"], packed["b"])
    return out[:, :3]


def init_params(key, pc_feature_size, feature_size):
    """Deterministic nn.Linear-style init: U(-1/sqrt(fan_in), 1/sqrt(fan_in))."""
    def linear(k, fan_in, fan_out):
        kw, kb = jax.random.split(k)
        bound = 1.0 / jnp.sqrt(fan_in)
        w = jax.random.uniform(kw, (fan_in, fan_out), jnp.float32, -bound, bound)
        b = jax.random.uniform(kb, (1, fan_out), jnp.float32, -bound, bound)
        return w, b

    keys = jax.random.split(key, 5)
    F, PC = feature_size, pc_feature_size
    w1, b1 = linear(keys[0], PC, F)                  # mlp1
    w2, b2 = linear(keys[1], F, F)                   # mlp2
    w3, b3 = linear(keys[2], F + 100 + F, 3)         # mlp3
    w_box, b_box = linear(keys[3], 3, 100)           # mlp_box
    w_feat, b_feat = linear(keys[4], F, F)           # mlp_feature
    return {"w1": w1, "b1": b1, "w2": w2, "b2": b2, "w3": w3, "b3": b3,
            "w_box": w_box, "b_box": b_box, "w_feat": w_feat, "b_feat": b_feat}


def pack_params(params, pc_feature_size, feature_size, dtype=jnp.bfloat16):
    """Pre-pack (once) raw params into lane-dense, zero-padded bf16 operands.

    Correctness invariant: every padded weight row/column AND every padded
    bias lane is zero, so padded activation lanes are tanh(0) = 0 and never
    contribute to the final regression output.
    """
    F, PC = feature_size, pc_feature_size
    assert F <= SEG and 100 <= SEG, "segment width too small for this config"

    w1 = jnp.zeros((PC, SEG), jnp.float32).at[:, 0:F].set(params["w1"])
    w_box = jnp.zeros((3, SEG), jnp.float32).at[:, 0:100].set(params["w_box"])
    w_feat = jnp.zeros((F, SEG), jnp.float32).at[:, 0:F].set(params["w_feat"])
    w2 = jnp.zeros((SEG, SEG), jnp.float32).at[0:F, 0:F].set(params["w2"])

    # mlp3 weight: each concat segment at a 128-aligned sublane offset, and
    # the 3 output columns padded to a lane-dense 128 (zeros elsewhere).
    w3 = jnp.zeros((3 * SEG, SEG), jnp.float32)
    w3 = w3.at[0:F, 0:3].set(params["w3"][0:F, :])
    w3 = w3.at[SEG:SEG + 100, 0:3].set(params["w3"][F:F + 100, :])
    w3 = w3.at[2 * SEG:2 * SEG + F, 0:3].set(params["w3"][F + 100:, :])

    # All biases in one (1, 640) f32 buffer at 128-aligned lane offsets.
    b = jnp.zeros((1, 5 * SEG), jnp.float32)
    b = b.at[:, 0:F].set(params["b1"])
    b = b.at[:, SEG:SEG + 100].set(params["b_box"])
    b = b.at[:, 2 * SEG:2 * SEG + F].set(params["b_feat"])
    b = b.at[:, 3 * SEG:3 * SEG + F].set(params["b2"])
    b = b.at[:, 4 * SEG:4 * SEG + 3].set(params["b3"])

    return {"w1": w1.astype(dtype), "w_box": w_box.astype(dtype),
            "w_feat": w_feat.astype(dtype), "w2": w2.astype(dtype),
            "w3": w3.astype(dtype), "b": b}


def box_decoder_ref(pc_feature, input_box, feature, params):
    """Pure-JAX f32 reference mirroring the PyTorch forward."""
    out = jnp.tanh(pc_feature @ params["w1"] + params["b1"])
    out = jnp.tanh(out @ params["w2"] + params["b2"])
    out_box = jnp.tanh(input_box @ params["w_box"] + params["b_box"])
    out_feat = jnp.tanh(feature @ params["w_feat"] + params["b_feat"])
    vector = jnp.concatenate([out, out_box, out_feat], axis=1)
    return vector @ params["w3"] + params["b3"]


if __name__ == "__main__":
    B = 8                  # batch of tree nodes per call
    PC_FEATURE_SIZE = 32
    FEATURE_SIZE = 32

    key = jax.random.PRNGKey(0)
    k_params, k_pc, k_box, k_feat = jax.random.split(key, 4)

    params = init_params(k_params, PC_FEATURE_SIZE, FEATURE_SIZE)
    packed = pack_params(params, PC_FEATURE_SIZE, FEATURE_SIZE)

    pc_feature = jax.random.normal(k_pc, (B, PC_FEATURE_SIZE), jnp.float32)
    input_box = jax.random.normal(k_box, (B, 3), jnp.float32)
    feature = jax.random.normal(k_feat, (B, FEATURE_SIZE), jnp.float32)

    box_decoder_jit = jax.jit(functools.partial(box_decoder, block_rows=512))
    reg = box_decoder_jit(pc_feature, input_box, feature, packed)
    jax.block_until_ready(reg)

    ref = box_decoder_ref(pc_feature, input_box, feature, params)
    assert reg.shape == (B, 3)
    max_err = float(jnp.max(jnp.abs(reg - ref)))
    # bf16 weight/activation storage => looser tolerance than pure f32.
    assert jnp.allclose(reg, ref, atol=3e-2, rtol=3e-2), (
        f"mismatch vs reference (max abs err {max_err})")

    print("KERNEL_OK")
</pallas_src>

<mosaic_0001>
module attributes {stable_mosaic.version = 11 : i64} {
  func.func @box_decoder_kernel(%arg0: i32, %arg1: memref<8x32xf32, #tpu.memory_space<vmem>>, %arg2: memref<8x3xf32, #tpu.memory_space<vmem>>, %arg3: memref<8x32xf32, #tpu.memory_space<vmem>>, %arg4: memref<32x128xbf16, #tpu.memory_space<vmem>>, %arg5: memref<3x128xbf16, #tpu.memory_space<vmem>>, %arg6: memref<32x128xbf16, #tpu.memory_space<vmem>>, %arg7: memref<128x128xbf16, #tpu.memory_space<vmem>>, %arg8: memref<384x128xbf16, #tpu.memory_space<vmem>>, %arg9: memref<1x640xf32, #tpu.memory_space<vmem>>, %arg10: memref<8x128xf32, #tpu.memory_space<vmem>>) attributes {dimension_semantics = [#tpu.dimension_semantics<parallel>], iteration_bounds = array<i64: 1>, scalar_prefetch = 0 : i64, scratch_operands = 0 : i64, tpu.core_type = #tpu.core_type<tc>, window_params = [{transform_indices = @transform_0, window_bounds = array<i64: 8, 32>}, {transform_indices = @transform_1, window_bounds = array<i64: 8, 3>}, {transform_indices = @transform_2, window_bounds = array<i64: 8, 32>}, {pipeline_mode = #tpu.pipeline_mode<synchronous>, transform_indices = @transform_3, window_bounds = array<i64: 32, 128>}, {pipeline_mode = #tpu.pipeline_mode<synchronous>, transform_indices = @transform_4, window_bounds = array<i64: 3, 128>}, {pipeline_mode = #tpu.pipeline_mode<synchronous>, transform_indices = @transform_5, window_bounds = array<i64: 32, 128>}, {pipeline_mode = #tpu.pipeline_mode<synchronous>, transform_indices = @transform_6, window_bounds = array<i64: 128, 128>}, {pipeline_mode = #tpu.pipeline_mode<synchronous>, transform_indices = @transform_7, window_bounds = array<i64: 384, 128>}, {pipeline_mode = #tpu.pipeline_mode<synchronous>, transform_indices = @transform_8, window_bounds = array<i64: 1, 640>}, {transform_indices = @transform_9, window_bounds = array<i64: 8, 128>}]} {
    %c0 = arith.constant 0 : index
    %c0_0 = arith.constant 0 : index
    %0 = vector.load %arg9[%c0, %c0_0] : memref<1x640xf32, #tpu.memory_space<vmem>>, vector<1x128xf32>
    %c0_1 = arith.constant 0 : index
    %c128 = arith.constant 128 : index
    %1 = vector.load %arg9[%c0_1, %c128] : memref<1x640xf32, #tpu.memory_space<vmem>>, vector<1x128xf32>
    %c0_2 = arith.constant 0 : index
    %c256 = arith.constant 256 : index
    %2 = vector.load %arg9[%c0_2, %c256] : memref<1x640xf32, #tpu.memory_space<vmem>>, vector<1x128xf32>
    %c0_3 = arith.constant 0 : index
    %c384 = arith.constant 384 : index
    %3 = vector.load %arg9[%c0_3, %c384] : memref<1x640xf32, #tpu.memory_space<vmem>>, vector<1x128xf32>
    %c0_4 = arith.constant 0 : index
    %c512 = arith.constant 512 : index
    %4 = vector.load %arg9[%c0_4, %c512] : memref<1x640xf32, #tpu.memory_space<vmem>>, vector<1x128xf32>
    %c0_5 = arith.constant 0 : index
    %c0_6 = arith.constant 0 : index
    %5 = vector.load %arg1[%c0_5, %c0_6] : memref<8x32xf32, #tpu.memory_space<vmem>>, vector<8x32xf32>
    %6 = arith.truncf %5 : vector<8x32xf32> to vector<8x32xbf16>
    %c0_7 = arith.constant 0 : index
    %c0_8 = arith.constant 0 : index
    %7 = vector.load %arg2[%c0_7, %c0_8] : memref<8x3xf32, #tpu.memory_space<vmem>>, vector<8x3xf32>
    %8 = arith.truncf %7 : vector<8x3xf32> to vector<8x3xbf16>
    %c0_9 = arith.constant 0 : index
    %c0_10 = arith.constant 0 : index
    %9 = vector.load %arg3[%c0_9, %c0_10] : memref<8x32xf32, #tpu.memory_space<vmem>>, vector<8x32xf32>
    %10 = arith.truncf %9 : vector<8x32xf32> to vector<8x32xbf16>
    %c0_11 = arith.constant 0 : index
    %c0_12 = arith.constant 0 : index
    %11 = vector.load %arg4[%c0_11, %c0_12] : memref<32x128xbf16, #tpu.memory_space<vmem>>, vector<32x128xbf16>
    %cst = arith.constant dense<0.000000e+00> : vector<8x128xf32>
    %12 = tpu.matmul %6, %11, %cst {dimension_numbers = #tpu.dot_dimension_numbers<[1], [0], [0], [1], [0, 0, 1, 1], [], []>} : vector<8x32xbf16>, vector<32x128xbf16>, vector<8x128xf32> -> vector<8x128xf32>
    %13 = vector.broadcast %0 : vector<1x128xf32> to vector<8x128xf32>
    %14 = arith.addf %12, %13 : vector<8x128xf32>
    %15 = math.tanh %14 : vector<8x128xf32>
    %16 = arith.truncf %15 : vector<8x128xf32> to vector<8x128xbf16>
    %c0_13 = arith.constant 0 : index
    %c0_14 = arith.constant 0 : index
    %17 = vector.load %arg5[%c0_13, %c0_14] : memref<3x128xbf16, #tpu.memory_space<vmem>>, vector<3x128xbf16>
    %cst_15 = arith.constant dense<0.000000e+00> : vector<8x128xf32>
    %18 = tpu.matmul %8, %17, %cst_15 {dimension_numbers = #tpu.dot_dimension_numbers<[1], [0], [0], [1], [0, 0, 1, 1], [], []>} : vector<8x3xbf16>, vector<3x128xbf16>, vector<8x128xf32> -> vector<8x128xf32>
    %19 = vector.broadcast %1 : vector<1x128xf32> to vector<8x128xf32>
    %20 = arith.addf %18, %19 : vector<8x128xf32>
    %21 = math.tanh %20 : vector<8x128xf32>
    %22 = arith.truncf %21 : vector<8x128xf32> to vector<8x128xbf16>
    %c0_16 = arith.constant 0 : index
    %c0_17 = arith.constant 0 : index
    %23 = vector.load %arg6[%c0_16, %c0_17] : memref<32x128xbf16, #tpu.memory_space<vmem>>, vector<32x128xbf16>
    %cst_18 = arith.constant dense<0.000000e+00> : vector<8x128xf32>
    %24 = tpu.matmul %10, %23, %cst_18 {dimension_numbers = #tpu.dot_dimension_numbers<[1], [0], [0], [1], [0, 0, 1, 1], [], []>} : vector<8x32xbf16>, vector<32x128xbf16>, vector<8x128xf32> -> vector<8x128xf32>
    %25 = vector.broadcast %2 : vector<1x128xf32> to vector<8x128xf32>
    %26 = arith.addf %24, %25 : vector<8x128xf32>
    %27 = math.tanh %26 : vector<8x128xf32>
    %28 = arith.truncf %27 : vector<8x128xf32> to vector<8x128xbf16>
    %c0_19 = arith.constant 0 : index
    %c0_20 = arith.constant 0 : index
    %29 = vector.load %arg7[%c0_19, %c0_20] : memref<128x128xbf16, #tpu.memory_space<vmem>>, vector<128x128xbf16>
    %cst_21 = arith.constant dense<0.000000e+00> : vector<8x128xf32>
    %30 = tpu.matmul %16, %29, %cst_21 {dimension_numbers = #tpu.dot_dimension_numbers<[1], [0], [0], [1], [0, 0, 1, 1], [], []>} : vector<8x128xbf16>, vector<128x128xbf16>, vector<8x128xf32> -> vector<8x128xf32>
    %31 = vector.broadcast %3 : vector<1x128xf32> to vector<8x128xf32>
    %32 = arith.addf %30, %31 : vector<8x128xf32>
    %33 = math.tanh %32 : vector<8x128xf32>
    %34 = arith.truncf %33 : vector<8x128xf32> to vector<8x128xbf16>
    %c0_22 = arith.constant 0 : index
    %c0_23 = arith.constant 0 : index
    %35 = vector.load %arg8[%c0_22, %c0_23] : memref<384x128xbf16, #tpu.memory_space<vmem>>, vector<128x128xbf16>
    %cst_24 = arith.constant dense<0.000000e+00> : vector<8x128xf32>
    %36 = tpu.matmul %34, %35, %cst_24 {dimension_numbers = #tpu.dot_dimension_numbers<[1], [0], [0], [1], [0, 0, 1, 1], [], []>} : vector<8x128xbf16>, vector<128x128xbf16>, vector<8x128xf32> -> vector<8x128xf32>
    %c128_25 = arith.constant 128 : index
    %c0_26 = arith.constant 0 : index
    %37 = vector.load %arg8[%c128_25, %c0_26] : memref<384x128xbf16, #tpu.memory_space<vmem>>, vector<128x128xbf16>
    %cst_27 = arith.constant dense<0.000000e+00> : vector<8x128xf32>
    %38 = tpu.matmul %22, %37, %cst_27 {dimension_numbers = #tpu.dot_dimension_numbers<[1], [0], [0], [1], [0, 0, 1, 1], [], []>} : vector<8x128xbf16>, vector<128x128xbf16>, vector<8x128xf32> -> vector<8x128xf32>
    %39 = arith.addf %36, %38 : vector<8x128xf32>
    %c256_28 = arith.constant 256 : index
    %c0_29 = arith.constant 0 : index
    %40 = vector.load %arg8[%c256_28, %c0_29] : memref<384x128xbf16, #tpu.memory_space<vmem>>, vector<128x128xbf16>
    %cst_30 = arith.constant dense<0.000000e+00> : vector<8x128xf32>
    %41 = tpu.matmul %28, %40, %cst_30 {dimension_numbers = #tpu.dot_dimension_numbers<[1], [0], [0], [1], [0, 0, 1, 1], [], []>} : vector<8x128xbf16>, vector<128x128xbf16>, vector<8x128xf32> -> vector<8x128xf32>
    %42 = arith.addf %39, %41 : vector<8x128xf32>
    %43 = vector.broadcast %4 : vector<1x128xf32> to vector<8x128xf32>
    %44 = arith.addf %42, %43 : vector<8x128xf32>
    %c0_31 = arith.constant 0 : index
    %c0_32 = arith.constant 0 : index
    %45 = vector.load %arg10[%c0_31, %c0_32] : memref<8x128xf32, #tpu.memory_space<vmem>>, vector<8x128xf32>
    tpu.vector_store %arg10[%c0_31, %c0_32], %44 {strides = array<i32>} : memref<8x128xf32, #tpu.memory_space<vmem>>, vector<8x128xf32>,
    return
  }
  func.func @transform_0(%arg0: i32) -> (i32, i32) {
    %c0_i32 = arith.constant 0 : i32
    %c0_i32_0 = arith.constant 0 : i32
    return %arg0, %c0_i32 : i32, i32
  }
  func.func @transform_1(%arg0: i32) -> (i32, i32) {
    %c0_i32 = arith.constant 0 : i32
    %c0_i32_0 = arith.constant 0 : i32
    return %arg0, %c0_i32 : i32, i32
  }
  func.func @transform_2(%arg0: i32) -> (i32, i32) {
    %c0_i32 = arith.constant 0 : i32
    %c0_i32_0 = arith.constant 0 : i32
    return %arg0, %c0_i32 : i32, i32
  }
  func.func @transform_3(%arg0: i32) -> (i32, i32) {
    %c0_i32 = arith.constant 0 : i32
    %c0_i32_0 = arith.constant 0 : i32
    %c0_i32_1 = arith.constant 0 : i32
    return %c0_i32, %c0_i32_0 : i32, i32
  }
  func.func @transform_4(%arg0: i32) -> (i32, i32) {
    %c0_i32 = arith.constant 0 : i32
    %c0_i32_0 = arith.constant 0 : i32
    %c0_i32_1 = arith.constant 0 : i32
    return %c0_i32, %c0_i32_0 : i32, i32
  }
  func.func @transform_5(%arg0: i32) -> (i32, i32) {
    %c0_i32 = arith.constant 0 : i32
    %c0_i32_0 = arith.constant 0 : i32
    %c0_i32_1 = arith.constant 0 : i32
    return %c0_i32, %c0_i32_0 : i32, i32
  }
  func.func @transform_6(%arg0: i32) -> (i32, i32) {
    %c0_i32 = arith.constant 0 : i32
    %c0_i32_0 = arith.constant 0 : i32
    %c0_i32_1 = arith.constant 0 : i32
    return %c0_i32, %c0_i32_0 : i32, i32
  }
  func.func @transform_7(%arg0: i32) -> (i32, i32) {
    %c0_i32 = arith.constant 0 : i32
    %c0_i32_0 = arith.constant 0 : i32
    %c0_i32_1 = arith.constant 0 : i32
    return %c0_i32, %c0_i32_0 : i32, i32
  }
  func.func @transform_8(%arg0: i32) -> (i32, i32) {
    %c0_i32 = arith.constant 0 : i32
    %c0_i32_0 = arith.constant 0 : i32
    %c0_i32_1 = arith.constant 0 : i32
    return %c0_i32, %c0_i32_0 : i32, i32
  }
  func.func @transform_9(%arg0: i32) -> (i32, i32) {
    %c0_i32 = arith.constant 0 : i32
    %c0_i32_0 = arith.constant 0 : i32
    return %arg0, %c0_i32 : i32, i32
  }
}

</mosaic_0001>

<bundles_post_ra>
// kernel: box_decoder.1
= control target key start
LH: loop header
LB: loop body
LE: loop exit
PB: predicated region body
PF: predicated region fallthrough
CT: control target
= control target key end

     0   :  { %14 = vsyncpa [#allocation3], 0  ;;  %s1301_s0 = inlined_call_operand.hbm [shape: f32[8,32], index: 0, kind: input, shape index: {}]   ;;  %s1302_s1 = inlined_call_operand.vmem [shape: f32[8,3], index: 1, kind: input, shape index: {}]   ;;  %s1303_s2 = inlined_call_operand.hbm [shape: f32[8,32], index: 2, kind: input, shape index: {}]   ;;  %s1304_s3 = inlined_call_operand.vmem [shape: bf16[32,128], index: 3, kind: input, shape index: {}]   ;;  %s1305_s4 = inlined_call_operand.vmem [shape: bf16[3,128], index: 4, kind: input, shape index: {}]   ;;  %s1306_s5 = inlined_call_operand.vmem [shape: bf16[32,128], index: 5, kind: input, shape index: {}]   ;;  %s1307_s6 = inlined_call_operand.hbm [shape: bf16[128,128], index: 6, kind: input, shape index: {}]   ;;  %s1308_s7 = inlined_call_operand.hbm [shape: bf16[384,128], index: 7, kind: input, shape index: {}]   ;;  %s1309_s8 = inlined_call_operand.hbm [shape: f32[1,640], index: 8, kind: input, shape index: {}]   ;;  %s1310_s9 = inlined_call_operand.vmem [shape: f32[8,128], index: 9, kind: output, shape index: {}]  }
   0x1   :  { %15 = vsyncpa [#allocation5], 0 }
   0x2   :  { %16 = vsyncpa [#allocation8], 0  ;;  %s1101_s30 = smov [#allocation4]   ;;  %s985_s13 = scalar_lea.hbm %s1303_s2, 128 }
   0x3   :  { %s35_s10 = sshll.u32 %s1101_s30, 4  ;;  %p986_p0 = scmp.ne.s32.totalorder %s1303_s2, %s985_s13  ;;  %s36_s10 = int_to_ptr.vmem [resolvable:$true] %s35_s10 }
   0x4   :  { %p989_p1 = scmp.lt.u32.totalorder %s985_s13, %s1303_s2 }
   0x6   :  { %p991_p2 = pnand %p989_p1, %p986_p0 }
   0x8   :  { %994 = shalt.err (!%p991_p2)
}
   0x9   :  { %s995_s18 = scalar_lea.vmem %s36_s10, 128  ;;  %p1000_p4 = scmp.lt.s32.totalorder %s36_s10, %s36_s10 }
   0xa   :  { %p996_p3 = scmp.ne.s32.totalorder %s36_s10, %s995_s18  ;;  %p1001_p5 = scmp.lt.s32.totalorder %s995_s18, %s995_s18 }
   0xc   :  { %p1002_p6 = por %p1001_p5, %p1000_p4 }
   0xe   :  { %p1003_p7 = pnand %p1002_p6, %p996_p3 }
  0x10   :  { %1006 = shalt.err (!%p1003_p7)
}
  0x11   :  { %38 = dma.hbm_to_vmem [thread:$0]  %s1303_s2, 128, %s36_s10, [#allocation5]  }
  0x12   :  { %s1102_s21 = smov [#allocation7]   ;;  %s1103_s23 = smov [#allocation2]  }
  0x13   :  { %s62_s22 = sshll.u32 %s1102_s21, 4  ;;  %s23_s24 = sshll.u32 %s1103_s23, 4  ;;  %s63_s22 = int_to_ptr.vmem [resolvable:$true] %s62_s22  ;;  %s24_s24 = int_to_ptr.vmem [resolvable:$true] %s23_s24 }
  0x14   :  { %s1007_s27 = scalar_lea.hbm %s1308_s7, 3072 }
  0x15   :  { %p1008_p8 = scmp.ne.s32.totalorder %s1308_s7, %s1007_s27  ;;  %p1011_p9 = scmp.lt.u32.totalorder %s1007_s27, %s1308_s7 }
  0x17   :  { %p1013_p10 = pnand %p1011_p9, %p1008_p8 }
  0x19   :  { %1016 = shalt.err (!%p1013_p10)
}
  0x1a   :  { %s1017_s2 = scalar_lea.vmem %s63_s22, 3072  ;;  %p1022_p12 = scmp.lt.s32.totalorder %s63_s22, %s63_s22 }
  0x1b   :  { %p1018_p11 = scmp.ne.s32.totalorder %s63_s22, %s1017_s2  ;;  %p1023_p13 = scmp.lt.s32.totalorder %s1017_s2, %s1017_s2 }
  0x1d   :  { %p1024_p0 = por %p1023_p13, %p1022_p12 }
  0x1f   :  { %p1025_p1 = pnand %p1024_p0, %p1018_p11 }
  0x21   :  { %1028 = shalt.err (!%p1025_p1)
}
  0x22   :  { %s1104_s10 = smov 64   ;;  %s1105_s12 = smov 4  }
  0x23   :  { %68 = dma.hbm_to_vmem [thread:$0]  %s1308_s7, 3072, %s63_s22, [#allocation8], %s1104_s10, %s1104_s10, %s1105_s12  }
  0x24   :  { %s1029_s17 = scalar_lea.hbm %s1301_s0, 128 }
  0x25   :  { %p1030_p2 = scmp.ne.s32.totalorder %s1301_s0, %s1029_s17  ;;  %p1033_p3 = scmp.lt.u32.totalorder %s1029_s17, %s1301_s0 }
  0x27   :  { %p1035_p4 = pnand %p1033_p3, %p1030_p2 }
  0x29   :  { %1038 = shalt.err (!%p1035_p4)
}
  0x2a   :  { %s1039_s23 = scalar_lea.vmem %s24_s24, 128  ;;  %p1044_p6 = scmp.lt.s32.totalorder %s24_s24, %s24_s24 }
  0x2b   :  { %p1040_p5 = scmp.ne.s32.totalorder %s24_s24, %s1039_s23  ;;  %p1045_p7 = scmp.lt.s32.totalorder %s1039_s23, %s1039_s23 }
  0x2d   :  { %p1046_p8 = por %p1045_p7, %p1044_p6 }
  0x2f   :  { %p1047_p9 = pnand %p1046_p8, %p1040_p5 }
  0x31   :  { %1050 = shalt.err (!%p1047_p9)
}
  0x32   :  { %26 = dma.hbm_to_vmem [thread:$0]  %s1301_s0, 128, %s24_s24, [#allocation3]  }
  0x33   :  { %s1106_s25 = smov [#allocation6]   ;;  %s1107_s27 = smov [#allocation9]  }
  0x34   :  { %s50_s26 = sshll.u32 %s1106_s25, 4  ;;  %s75_s28 = sshll.u32 %s1107_s27, 4  ;;  %s51_s26 = int_to_ptr.vmem [resolvable:$true] %s50_s26  ;;  %s76_s28 = int_to_ptr.vmem [resolvable:$true] %s75_s28 }
  0x35   :  { %s1051_s11 = scalar_lea.hbm %s1307_s6, 1024 }
  0x36   :  { %p1052_p10 = scmp.ne.s32.totalorder %s1307_s6, %s1051_s11  ;;  %p1055_p11 = scmp.lt.u32.totalorder %s1051_s11, %s1307_s6 }
  0x38   :  { %p1057_p12 = pnand %p1055_p11, %p1052_p10 }
  0x3a   :  { %1060 = shalt.err (!%p1057_p12)
}
  0x3b   :  { %s1061_s0 = scalar_lea.vmem %s51_s26, 1024  ;;  %p1066_p0 = scmp.lt.s32.totalorder %s51_s26, %s51_s26 }
  0x3c   :  { %p1062_p13 = scmp.ne.s32.totalorder %s51_s26, %s1061_s0  ;;  %p1067_p1 = scmp.lt.s32.totalorder %s1061_s0, %s1061_s0 }
  0x3e   :  { %p1068_p2 = por %p1067_p1, %p1066_p0 }
  0x40   :  { %p1069_p3 = pnand %p1068_p2, %p1062_p13 }
  0x42   :  { %1072 = shalt.err (!%p1069_p3)
}
  0x43   :  { %56 = dma.hbm_to_vmem [thread:$0]  %s1307_s6, 1024, %s51_s26, [#allocation5], %s1104_s10, %s1104_s10, %s1105_s12  }
  0x44   :  { %s1073_s19 = scalar_lea.hbm %s1309_s8, 80 }
  0x45   :  { %p1074_p4 = scmp.ne.s32.totalorder %s1309_s8, %s1073_s19  ;;  %p1077_p5 = scmp.lt.u32.totalorder %s1073_s19, %s1309_s8 }
  0x47   :  { %p1079_p6 = pnand %p1077_p5, %p1074_p4 }
  0x49   :  { %1082 = shalt.err (!%p1079_p6)
}
  0x4a   :  { %s1083_s22 = scalar_lea.vmem %s76_s28, 80  ;;  %s1087_s25 = scalar_lea.vmem %s76_s28, 96 }
  0x4b   :  { %p1084_p7 = scmp.ne.s32.totalorder %s76_s28, %s1083_s22  ;;  %p1088_p8 = scmp.lt.s32.totalorder %s76_s28, %s76_s28 }
  0x4c   :  { %p1089_p9 = scmp.lt.s32.totalorder %s1087_s25, %s1083_s22 }
  0x4e   :  { %p1090_p10 = por %p1089_p9, %p1088_p8 }
  0x50   :  { %p1091_p11 = pnand %p1090_p10, %p1084_p7 }
  0x52   :  { %1094 = shalt.err (!%p1091_p11)
}
  0x53   :  { %78 = dma.hbm_to_vmem [thread:$0]  %s1309_s8, 80, %s76_s28, [#allocation8]  }
  0x54   :  { %1095 = dma.done.wait [#allocation3], 128  }
  0x55   :  { %1096 = vsyncadd [#allocation3], 4294967168 }
  0x56   :  { %1097 = dma.done.wait [#allocation5], 1152  }
  0x57   :  { %1098 = vsyncadd [#allocation5], 4294966144 }
  0x58   :  { %1099 = dma.done.wait [#allocation8], 3152  }
  0x59   :  { %1100 = vsyncadd [#allocation8], 4294964144  ;;  %v1108_v0 = vmov 0.0   ;;  %vm1109_vm0 = vmmov 0   ;;  %vm185_vm1 = vcmask 1040384   ;;  %vm186_vm2 = vcmask 1041408  }
  0x5a   :  { %829 = vmatprep.subr.bf16.mxu0 %v1108_v0  ;;  %833 = vmatprep.mubr.msk.bf16.mxu0 %vm1109_vm0, %v1108_v0  ;;  %v1110_v1 = vmov 65535   ;;  %v941_v3 = vld [vmem:[%s1304_s3] sm:$0xff]   ;;  %v942_v5 = vld [vmem:[%s1304_s3 + $0x8] sm:$0xff]   ;;  %vm181_vm3 = vcmask 23552   ;;  %vm128_vm4 = vcmask 261120   ;;  %v943_v12 = vld [vmem:[#allocation6] sm:$0xff]  }
  0x5b   :  { %837 = vmatprep.subr.bf16.mxu1 %v1108_v0  ;;  %839 = vmatprep.mubr.msk.bf16.mxu1 %vm1109_vm0, %v1108_v0  ;;  %v187_v2 = vsel %vm185_vm1, 4294967295, %v1110_v1  ;;  %v100_v6 = vld [vmem:[#allocation2] sm:$0xff]  ;;  %v944_v13 = vld [vmem:[#allocation6 + $0x8] sm:$0xff]   ;;  %v946_v15 = vld [vmem:[#allocation6 + $0x18] sm:$0xff]  }
  0x5c   :  { %v188_v4 = vsel %vm186_vm2, %v187_v2, 0  ;;  %830 = vmatpush3.bf16.msra.mxu0 %v941_v3  ;;  %v174_v7 = vld [vmem:[%s1305_s4] sm:$0x3]  ;;  %v101_v11 = vpack.c.bf16 %v100_v6, %v100_v6  ;;  %v947_v16 = vld [vmem:[#allocation6 + $0x20] sm:$0xff]   ;;  %v948_v17 = vld [vmem:[#allocation6 + $0x28] sm:$0xff]  }
  0x5d   :  { %v102_v8 = vld [vmem:[%s1302_s1] sm:$0xff]  ;;  %831 = vmatprep.subr.bf16.mxu0 %v1108_v0  ;;  %v190_v9 = vand.u32 %v188_v4, %v174_v7  ;;  %v951_v20 = vld [vmem:[%s1306_s5 + $0x8] sm:$0xff]   ;;  %v953_v24 = vld [vmem:[#allocation7 + $0x40] sm:$0xff]  }
  0x5e   :  { %v103_v10 = vpack.c.bf16 %v102_v8, %v102_v8  ;;  %v945_v14 = vld [vmem:[#allocation6 + $0x10] sm:$0xff]   ;;  %v952_v21 = vld [vmem:[#allocation6 + $0x38] sm:$0xff]   ;;  %v954_v25 = vld [vmem:[#allocation7 + $0x48] sm:$0xff]  }
  0x5f   :  { %838 = vmatpush3.bf16.msra.mxu1 %v190_v9  ;;  %v949_v18 = vld [vmem:[%s1306_s5] sm:$0xff]   ;;  %v104_v22 = vld [vmem:[#allocation4] sm:$0xff]  ;;  %v957_v28 = vld [vmem:[#allocation7 + $0x60] sm:$0xff]  }
  0x60   :  { %832 = vmatpush3.bf16.msra.mxu0 %v942_v5  ;;  %843 = vmatprep.subr.bf16.mxu1 %v1108_v0  ;;  %v950_v19 = vld [vmem:[#allocation6 + $0x30] sm:$0xff]   ;;  %v105_v23 = vpack.c.bf16 %v104_v22, %v104_v22  ;;  %v956_v27 = vld [vmem:[#allocation7 + $0x58] sm:$0xff]   ;;  %v958_v29 = vld [vmem:[#allocation7 + $0x68] sm:$0xff]  }
  0x61   :  { %851 = vmatprep.subr.bf16.mxu0 %v1108_v0  ;;  %v955_v26 = vld [vmem:[#allocation7 + $0x50] sm:$0xff]   ;;  %v960_v31 = vld [vmem:[#allocation7 + $0x78] sm:$0xff]   ;;  %v745_v32 = vld [vmem:[#allocation9 + $0x1] ss:$0 sm:$0xff] }
  0x62   :  { %840 = vmatmul.mubr.msk.bf16.vlgmr.msra.gmra.mrb[0].mxu1 %vm181_vm3, %v103_v10  ;;  %v959_v30 = vld [vmem:[#allocation7 + $0x70] sm:$0xff]   ;;  %v741_v33 = vld [vmem:[#allocation9] ss:$0 sm:$0xff]  ;;  %v963_v50 = vld [vmem:[#allocation7 + $0x88] sm:$0xff]  }
  0x63   :  { %834 = vmatmul.mubr.msk.bf16.vlgmr.msra.gmra.mrb[0].mxu0 %vm128_vm4, %v101_v11  ;;  %847 = vmatprep.mubr.msk.bf16.mxu1 %vm1109_vm0, %v1108_v0  ;;  %v961_v45 = vld [vmem:[#allocation7 + $0x80] sm:$0xff]   ;;  %v964_v51 = vld [vmem:[#allocation7 + $0x8] sm:$0xff]   ;;  %v965_v52 = vld [vmem:[#allocation7 + $0x90] sm:$0xff]  }
  0x64   :  { %852 = vmatpush3.bf16.msra.mxu0 %v943_v12  ;;  %867 = vmatprep.mubr.msk.bf16.mxu0 %vm1109_vm0, %v1108_v0  ;;  %v962_v48 = vld [vmem:[#allocation7] sm:$0xff]   ;;  %v966_v53 = vld [vmem:[#allocation7 + $0x10] sm:$0xff]   ;;  %v967_v54 = vld [vmem:[#allocation7 + $0x98] sm:$0xff]  }
  0x65   :  { %853 = vmatprep.subr.bf16.mxu0 %v1108_v0  ;;  %844 = vmatpush3.bf16.msra.mxu1 %v949_v18  ;;  %v968_v55 = vld [vmem:[#allocation7 + $0x18] sm:$0xff]   ;;  %v747_v56 = vld [vmem:[#allocation9 + $0x2] ss:$0 sm:$0xff]  ;;  %v971_v1 = vld [vmem:[#allocation7 + $0xa8] sm:$0xff]  }
  0x66   :  { %845 = vmatprep.subr.bf16.mxu1 %v1108_v0  ;;  %v969_v57 = vld [vmem:[#allocation7 + $0xa0] sm:$0xff]   ;;  %v972_v2 = vld [vmem:[#allocation7 + $0x28] sm:$0xff]   ;;  %v973_v3 = vld [vmem:[#allocation7 + $0xb0] sm:$0xff]  }
  0x67   :  { %v970_v59 = vld [vmem:[#allocation7 + $0x20] sm:$0xff]   ;;  %v974_v4 = vld [vmem:[#allocation7 + $0x30] sm:$0xff]   ;;  %v975_v5 = vld [vmem:[#allocation7 + $0xb8] sm:$0xff]  }
  0x68   :  { %854 = vmatpush3.bf16.msra.mxu0 %v944_v13  ;;  %v976_v6 = vld [vmem:[#allocation7 + $0x38] sm:$0xff]   ;;  %v751_v9 = vld [vmem:[#allocation9 + $0x3] ss:$0 sm:$0xff] }
  0x69   :  { %855 = vmatprep.subr.bf16.mxu0 %v1108_v0  ;;  %846 = vmatpush3.bf16.msra.mxu1 %v951_v20 }
  0x6a   :  { %871 = vmatprep.subr.bf16.mxu1 %v1108_v0 }
  0x6c   :  { %856 = vmatpush3.bf16.msra.mxu0 %v945_v14  ;;  %848 = vmatmul.mubr.msk.bf16.vlgmr.msra.gmra.mrb[4].mxu1 %vm128_vm4, %v105_v23 }
  0x6d   :  { %857 = vmatprep.subr.bf16.mxu0 %v1108_v0  ;;  %887 = vmatprep.mubr.msk.bf16.mxu1 %vm1109_vm0, %v1108_v0 }
  0x6e   :  { %872 = vmatpush3.bf16.msra.mxu1 %v953_v24 }
  0x6f   :  { %873 = vmatprep.subr.bf16.mxu1 %v1108_v0 }
  0x70   :  { %858 = vmatpush3.bf16.msra.mxu0 %v946_v15 }
  0x71   :  { %859 = vmatprep.subr.bf16.mxu0 %v1108_v0 }
  0x72   :  { %874 = vmatpush3.bf16.msra.mxu1 %v954_v25 }
  0x73   :  { %875 = vmatprep.subr.bf16.mxu1 %v1108_v0 }
  0x74   :  { %860 = vmatpush3.bf16.msra.mxu0 %v947_v16 }
  0x75   :  { %861 = vmatprep.subr.bf16.mxu0 %v1108_v0 }
  0x76   :  { %876 = vmatpush3.bf16.msra.mxu1 %v955_v26 }
  0x77   :  { %877 = vmatprep.subr.bf16.mxu1 %v1108_v0 }
  0x78   :  { %862 = vmatpush3.bf16.msra.mxu0 %v948_v17 }
  0x79   :  { %863 = vmatprep.subr.bf16.mxu0 %v1108_v0 }
  0x7a   :  { %878 = vmatpush3.bf16.msra.mxu1 %v956_v27  ;;  %v784_v27 = vld [vmem:[#allocation9 + $0x4] ss:$0 sm:$0xff] }
  0x7b   :  { %879 = vmatprep.subr.bf16.mxu1 %v1108_v0 }
  0x7c   :  { %864 = vmatpush3.bf16.msra.mxu0 %v950_v19 }
  0x7d   :  { %865 = vmatprep.subr.bf16.mxu0 %v1108_v0 }
  0x7e   :  { %880 = vmatpush3.bf16.msra.mxu1 %v957_v28 }
  0x7f   :  { %881 = vmatprep.subr.bf16.mxu1 %v1108_v0 }
  0x80   :  { %866 = vmatpush3.bf16.msra.mxu0 %v952_v21 }
  0x81   :  { %891 = vmatprep.subr.bf16.mxu0 %v1108_v0 }
  0x82   :  { %882 = vmatpush3.bf16.msra.mxu1 %v958_v29 }
  0x83   :  { %883 = vmatprep.subr.bf16.mxu1 %v1108_v0 }
  0x86   :  { %884 = vmatpush3.bf16.msra.mxu1 %v959_v30 }
  0x87   :  { %885 = vmatprep.subr.bf16.mxu1 %v1108_v0 }
  0x8a   :  { %886 = vmatpush3.bf16.msra.mxu1 %v960_v31 }
  0x8b   :  { %911 = vmatprep.subr.bf16.mxu1 %v1108_v0 }
 0x135   :  { %v226_v34 = vpop.f32.mrb[0].mxu1 }
 0x136   :  { %v166_v35 = vpop.f32.mrb[0].mxu0  ;;  %v227_v36 = vadd.f32 %v745_v32, %v226_v34  ;;  %v841_v37 = vpop.f32.mrb[1].mxu1 }
 0x137   :  { %v167_v38 = vadd.f32 %v741_v33, %v166_v35  ;;  %v835_v39 = vpop.f32.mrb[1].mxu0  ;;  %v229_v40 = vpop.f32.mrb[2].mxu1 }
 0x138   :  { %v169_v41 = vpop.f32.mrb[2].mxu0  ;;  %977 = vtanh.f32 %v227_v36  ;;  %v842_v42 = vpop.f32.mrb[3].mxu1 }
 0x139   :  { %979 = vtanh.f32 %v167_v38  ;;  %v836_v43 = vpop.f32.mrb[3].mxu0 }
 0x13f   :  { %v293_v58 = vpop.f32.mrb[4].mxu1 }
 0x140   :  { %v294_v60 = vadd.f32 %v747_v56, %v293_v58  ;;  %v849_v61 = vpop.f32.mrb[5].mxu1 }
 0x141   :  { %v296_v62 = vpop.f32.mrb[6].mxu1 }
 0x142   :  { %v978_v44 = vpop.eup %977  ;;  %981 = vtanh.f32 %v294_v60  ;;  %v850_v63 = vpop.f32.mrb[7].mxu1 }
 0x143   :  { %v980_v46 = vpop.eup %979  ;;  %v233_v47 = vpack.c.bf16 %v978_v44, %v978_v44 }
 0x144   :  { %v173_v49 = vpack.c.bf16 %v980_v46, %v980_v46 }
 0x145   :  { %888 = vmatmul.mubr.bf16.vlgmr.msra.gmra.mrb[8].mxu1 %v233_v47 }
 0x146   :  { %868 = vmatmul.mubr.bf16.vlgmr.msra.gmra.mrb[4].mxu0 %v173_v49  ;;  %912 = vmatpush3.bf16.msra.mxu1 %v961_v45 }
 0x147   :  { %892 = vmatpush3.bf16.msra.mxu0 %v962_v48  ;;  %913 = vmatprep.subr.bf16.mxu1 %v1108_v0 }
 0x148   :  { %893 = vmatprep.subr.bf16.mxu0 %v1108_v0  ;;  %927 = vmatprep.mubr.msk.bf16.mxu1 %vm1109_vm0, %v1108_v0 }
 0x149   :  { %907 = vmatprep.mubr.msk.bf16.mxu0 %vm1109_vm0, %v1108_v0 }
 0x14a   :  { %914 = vmatpush3.bf16.msra.mxu1 %v963_v50 }
 0x14b   :  { %894 = vmatpush3.bf16.msra.mxu0 %v964_v51  ;;  %915 = vmatprep.subr.bf16.mxu1 %v1108_v0 }
 0x14c   :  { %895 = vmatprep.subr.bf16.mxu0 %v1108_v0  ;;  %v982_v7 = vpop.eup %981 }
 0x14d   :  { %v300_v8 = vpack.c.bf16 %v982_v7, %v982_v7 }
 0x14e   :  { %916 = vmatpush3.bf16.msra.mxu1 %v965_v52 }
 0x14f   :  { %896 = vmatpush3.bf16.msra.mxu0 %v966_v53  ;;  %917 = vmatprep.subr.bf16.mxu1 %v1108_v0 }
 0x150   :  { %897 = vmatprep.subr.bf16.mxu0 %v1108_v0 }
 0x152   :  { %918 = vmatpush3.bf16.msra.mxu1 %v967_v54 }
 0x153   :  { %898 = vmatpush3.bf16.msra.mxu0 %v968_v55  ;;  %919 = vmatprep.subr.bf16.mxu1 %v1108_v0 }
 0x154   :  { %899 = vmatprep.subr.bf16.mxu0 %v1108_v0 }
 0x156   :  { %920 = vmatpush3.bf16.msra.mxu1 %v969_v57 }
 0x157   :  { %900 = vmatpush3.bf16.msra.mxu0 %v970_v59  ;;  %921 = vmatprep.subr.bf16.mxu1 %v1108_v0 }
 0x158   :  { %901 = vmatprep.subr.bf16.mxu0 %v1108_v0 }
 0x15a   :  { %922 = vmatpush3.bf16.msra.mxu1 %v971_v1 }
 0x15b   :  { %902 = vmatpush3.bf16.msra.mxu0 %v972_v2  ;;  %923 = vmatprep.subr.bf16.mxu1 %v1108_v0 }
 0x15c   :  { %903 = vmatprep.subr.bf16.mxu0 %v1108_v0 }
 0x15e   :  { %924 = vmatpush3.bf16.msra.mxu1 %v973_v3 }
 0x15f   :  { %904 = vmatpush3.bf16.msra.mxu0 %v974_v4  ;;  %925 = vmatprep.subr.bf16.mxu1 %v1108_v0 }
 0x160   :  { %905 = vmatprep.subr.bf16.mxu0 %v1108_v0 }
 0x162   :  { %926 = vmatpush3.bf16.msra.mxu1 %v975_v5 }
 0x163   :  { %906 = vmatpush3.bf16.msra.mxu0 %v976_v6 }
 0x165   :  { %928 = vmatmul.mubr.bf16.vlgmr.msra.gmra.mrb[12].mxu1 %v300_v8 }
 0x218   :  { %v527_v10 = vpop.f32.mrb[8].mxu1 }
 0x219   :  { %v405_v11 = vpop.f32.mrb[4].mxu0  ;;  %v889_v12 = vpop.f32.mrb[9].mxu1 }
 0x21a   :  { %v406_v13 = vadd.f32 %v751_v9, %v405_v11  ;;  %v869_v14 = vpop.f32.mrb[5].mxu0  ;;  %v530_v15 = vpop.f32.mrb[10].mxu1 }
 0x21b   :  { %v408_v16 = vpop.f32.mrb[6].mxu0  ;;  %v890_v17 = vpop.f32.mrb[11].mxu1 }
 0x21c   :  { %983 = vtanh.f32 %v406_v13  ;;  %v870_v18 = vpop.f32.mrb[7].mxu0 }
 0x226   :  { %v984_v19 = vpop.eup %983 }
 0x227   :  { %v412_v0 = vpack.c.bf16 %v984_v19, %v984_v19 }
 0x229   :  { %908 = vmatmul.mubr.bf16.vlgmr.msra.gmra.mrb[8].mxu0 %v412_v0 }
 0x238   :  { %v719_v20 = vpop.f32.mrb[12].mxu1 }
 0x239   :  { %v929_v21 = vpop.f32.mrb[13].mxu1 }
 0x23a   :  { %v722_v22 = vpop.f32.mrb[14].mxu1 }
 0x23b   :  { %v930_v23 = vpop.f32.mrb[15].mxu1 }
 0x2fc   :  { %v615_v24 = vpop.f32.mrb[8].mxu0 }
 0x2fd   :  { %v616_v25 = vadd.f32 %v615_v24, %v527_v10  ;;  %v909_v26 = vpop.f32.mrb[9].mxu0 }
 0x2fe   :  { %v618_v28 = vpop.f32.mrb[10].mxu0 }
 0x2ff   :  { %v725_v29 = vadd.f32 %v719_v20, %v616_v25  ;;  %v910_v30 = vpop.f32.mrb[11].mxu0 }
 0x301   :  { %v732_v31 = vadd.f32 %v784_v27, %v725_v29 }
 0x303   :  { %733 = vst [vmem:[%s1310_s9] sm:$0xff] %v732_v31 }
 0x304   :  { %738 = vsyncpa [#allocation3], 1 }
 0x305   :  { %739 = vsyncpa [#allocation5], 1 }
 0x306   :  { %740 = vsyncpa [#allocation8], 1 }

</bundles_post_ra>
